<compile_context>
chip_gen: v5e
topology: v5e:2x2
jax: 0.10.0
libtpu: 0.0.40
codegen_flags: <defaults>
</compile_context>

<pallas_src>
import jax
import jax.numpy as jnp
from jax.experimental import pallas as pl
from jax.experimental.pallas import tpu as pltpu


def _round_up(x, m):
    return ((x + m - 1) // m) * m


def _choose_tiles(n_pad):
    """n_pad is a multiple of 128; pick MXU-friendly tiles that divide it."""
    tm = 256 if n_pad % 256 == 0 else 128
    tn = tm
    tk = 512 if n_pad % 512 == 0 else tm
    return min(tm, n_pad), min(tn, n_pad), min(tk, n_pad)


def _choose_batch_block(B, n_pad):
    """Batch several small matmuls per grid step to amortize per-step overhead."""
    if n_pad <= 128:
        bb = 8
    elif n_pad <= 256:
        bb = 2
    else:
        bb = 1
    return max(1, min(bb, B))


def _gt_first_kernel(w1_ref, w2_ref, lhs_ref, rhs_ref, o_ref, acc_ref):
    # lhs_ref: (2, bb, tm, tk)   rhs_ref: (2, bb, tk, tn)   acc_ref: (bb, tm, tn) f32
    @pl.when(pl.program_id(3) == 0)
    def _init():
        acc_ref[...] = jnp.zeros_like(acc_ref)

    # GTConv channel combine in f32 (VPU), cast result to bf16 for the MXU.
    a = (w1_ref[0] * lhs_ref[0] + w1_ref[1] * lhs_ref[1]).astype(jnp.bfloat16)
    b = (w2_ref[0] * rhs_ref[0] + w2_ref[1] * rhs_ref[1]).astype(jnp.bfloat16)
    acc_ref[...] += jnp.einsum(
        "bik,bkj->bij", a, b, preferred_element_type=jnp.float32)

    @pl.when(pl.program_id(3) == pl.num_programs(3) - 1)
    def _store():
        o_ref[...] = acc_ref[...].astype(o_ref.dtype)


def _gt_notfirst_kernel(w1_ref, h_ref, rhs_ref, o_ref, acc_ref):
    # h_ref: (bb, tm, tk)   rhs_ref: (2, bb, tk, tn)   acc_ref: (bb, tm, tn) f32
    @pl.when(pl.program_id(3) == 0)
    def _init():
        acc_ref[...] = jnp.zeros_like(acc_ref)

    a = (w1_ref[0] * rhs_ref[0] + w1_ref[1] * rhs_ref[1]).astype(jnp.bfloat16)
    h = h_ref[...].astype(jnp.bfloat16)
    acc_ref[...] += jnp.einsum(
        "bik,bkj->bij", h, a, preferred_element_type=jnp.float32)

    @pl.when(pl.program_id(3) == pl.num_programs(3) - 1)
    def _store():
        o_ref[...] = acc_ref[...].astype(o_ref.dtype)


class GTLayer:
    """JAX/Pallas port of the PyTorch GTLayer."""

    def __init__(self, first=True, key=None):
        if key is None:
            key = jax.random.PRNGKey(0)
        self.first = first
        k1, k2 = jax.random.split(key)
        # nn.init.normal_ on a (2,1,1,1) parameter
        self.w1 = jax.random.normal(k1, (2, 1, 1, 1), dtype=jnp.float32)
        self.w2 = (jax.random.normal(k2, (2, 1, 1, 1), dtype=jnp.float32)
                   if first else None)

    def __call__(self, A, H_=None):
        C, B, N, _ = A.shape
        assert C == 2

        # softmax over dim=1 (singleton) -> ones; kept for exact semantic parity.
        w1_sm = jax.nn.softmax(self.w1, axis=1)
        w1_vec = w1_sm.reshape(2).astype(jnp.float32)

        # Pad N to a lane-dense multiple of 128; pick tiles and batch block.
        n_pad = _round_up(max(N, 128), 128)
        tm, tn, tk = _choose_tiles(n_pad)
        bb = _choose_batch_block(B, n_pad)
        b_pad = _round_up(B, bb)

        A_p = A
        if (n_pad != N) or (b_pad != B):
            A_p = jnp.pad(
                A, ((0, 0), (0, b_pad - B), (0, n_pad - N), (0, n_pad - N)))

        grid = (b_pad // bb, n_pad // tm, n_pad // tn, n_pad // tk)
        lhs_spec = pl.BlockSpec((2, bb, tm, tk), lambda b, i, j, k: (0, b, i, k))
        rhs_spec = pl.BlockSpec((2, bb, tk, tn), lambda b, i, j, k: (0, b, k, j))
        out_spec = pl.BlockSpec((bb, tm, tn), lambda b, i, j, k: (b, i, j))
        smem_spec = pl.BlockSpec(memory_space=pltpu.MemorySpace.SMEM)
        scratch = [pltpu.VMEM((bb, tm, tn), jnp.float32)]
        cparams = pltpu.CompilerParams(
            dimension_semantics=("parallel", "parallel", "parallel", "arbitrary"),
            vmem_limit_bytes=48 * 1024 * 1024,  # explicit; safe on v5e/v6e/v7x
        )
        out_shape = jax.ShapeDtypeStruct((b_pad, n_pad, n_pad), jnp.float32)

        if self.first:
            w2_sm = jax.nn.softmax(self.w2, axis=1)
            w2_vec = w2_sm.reshape(2).astype(jnp.float32)
            H_pad = pl.pallas_call(
                _gt_first_kernel,
                out_shape=out_shape,
                grid_spec=pltpu.PrefetchScalarGridSpec(
                    num_scalar_prefetch=0,
                    grid=grid,
                    in_specs=[smem_spec, smem_spec, lhs_spec, rhs_spec],
                    out_specs=out_spec,
                    scratch_shapes=scratch),
                compiler_params=cparams,
            )(w1_vec, w2_vec, A_p, A_p)
            W = [w1_sm, w2_sm]
        else:
            assert H_ is not None
            H_p = H_
            if (n_pad != N) or (b_pad != B):
                H_p = jnp.pad(
                    H_, ((0, b_pad - B), (0, n_pad - N), (0, n_pad - N)))
            h_spec = pl.BlockSpec((bb, tm, tk), lambda b, i, j, k: (b, i, k))
            H_pad = pl.pallas_call(
                _gt_notfirst_kernel,
                out_shape=out_shape,
                grid_spec=pltpu.PrefetchScalarGridSpec(
                    num_scalar_prefetch=0,
                    grid=grid,
                    in_specs=[smem_spec, h_spec, rhs_spec],
                    out_specs=out_spec,
                    scratch_shapes=scratch),
                compiler_params=cparams,
            )(w1_vec, H_p, A_p)
            W = [w1_sm]

        H = H_pad[:B, :N, :N]
        return H, W


def _reference(A, w1, w2=None, H_=None, first=True):
    """Pure-JAX reference mirroring the PyTorch forward.

    Operands are rounded to bf16 before the bmm (f32 accumulation), matching the
    kernel's MXU path, so the comparison can use a tight tolerance.
    """
    w1s = jax.nn.softmax(w1, axis=1)
    a = jnp.sum(A * w1s, axis=0)
    if first:
        w2s = jax.nn.softmax(w2, axis=1)
        b = jnp.sum(A * w2s, axis=0)
        lhs, rhs = a, b
    else:
        lhs, rhs = H_, a
    lhs = lhs.astype(jnp.bfloat16).astype(jnp.float32)
    rhs = rhs.astype(jnp.bfloat16).astype(jnp.float32)
    return jnp.einsum("bij,bjk->bik", lhs, rhs)


if __name__ == "__main__":
    key = jax.random.PRNGKey(0)
    k_a, k_h, k_p = jax.random.split(key, 3)

    C, B, N = 2, 2, 16
    A = jax.random.normal(k_a, (C, B, N, N), dtype=jnp.float32)

    # first=True path
    layer1 = GTLayer(first=True, key=k_p)
    H1, W1 = layer1(A)
    H1 = jax.block_until_ready(H1)
    assert H1.shape == (B, N, N)
    ref1 = _reference(A, layer1.w1, w2=layer1.w2, first=True)
    assert jnp.allclose(H1, ref1, atol=1e-3, rtol=1e-3), "first=True mismatch"

    # first=False path
    layer2 = GTLayer(first=False, key=k_p)
    H_prev = jax.random.normal(k_h, (B, N, N), dtype=jnp.float32)
    H2, W2 = layer2(A, H_prev)
    H2 = jax.block_until_ready(H2)
    assert H2.shape == (B, N, N)
    ref2 = _reference(A, layer2.w1, H_=H_prev, first=False)
    assert jnp.allclose(H2, ref2, atol=1e-3, rtol=1e-3), "first=False mismatch"

    print("KERNEL_OK")
</pallas_src>

<mosaic_0001>
module attributes {stable_mosaic.version = 11 : i64} {
  func.func @_gt_first_kernel(%arg0: i32, %arg1: i32, %arg2: i32, %arg3: i32, %arg4: memref<2xf32, #tpu.memory_space<smem>>, %arg5: memref<2xf32, #tpu.memory_space<smem>>, %arg6: memref<2x2x128x128xf32, #tpu.memory_space<vmem>>, %arg7: memref<2x2x128x128xf32, #tpu.memory_space<vmem>>, %arg8: memref<2x128x128xf32, #tpu.memory_space<vmem>>, %arg9: memref<2x128x128xf32, #tpu.memory_space<vmem>>) attributes {dimension_semantics = [#tpu.dimension_semantics<parallel>, #tpu.dimension_semantics<parallel>, #tpu.dimension_semantics<parallel>, #tpu.dimension_semantics<arbitrary>], iteration_bounds = array<i64: 1, 1, 1, 1>, scalar_prefetch = 0 : i64, scratch_operands = 1 : i64, tpu.core_type = #tpu.core_type<tc>, window_params = [{transform_indices = @transform_0, window_bounds = array<i64: 2>}, {transform_indices = @transform_1, window_bounds = array<i64: 2>}, {transform_indices = @transform_2, window_bounds = array<i64: 2, 2, 128, 128>}, {transform_indices = @transform_3, window_bounds = array<i64: 2, 2, 128, 128>}, {transform_indices = @transform_4, window_bounds = array<i64: 2, 128, 128>}]} {
    %c0_i32 = arith.constant 0 : i32
    %0 = arith.cmpi eq, %arg3, %c0_i32 : i32
    %1 = arith.extui %0 : i1 to i32
    %c0_i32_0 = arith.constant 0 : i32
    %2 = arith.cmpi ne, %1, %c0_i32_0 : i32
    scf.if %2 {
      %cst_27 = arith.constant 0.000000e+00 : f32
      %34 = vector.broadcast %cst_27 : f32 to vector<2x128x128xf32>
      %c0_28 = arith.constant 0 : index
      %c0_29 = arith.constant 0 : index
      %c0_30 = arith.constant 0 : index
      %35 = vector.load %arg9[%c0_28, %c0_29, %c0_30] : memref<2x128x128xf32, #tpu.memory_space<vmem>>, vector<2x128x128xf32>
      tpu.vector_store %arg9[%c0_28, %c0_29, %c0_30], %34 {strides = array<i32>} : memref<2x128x128xf32, #tpu.memory_space<vmem>>, vector<2x128x128xf32>,
    } else {
    }
    %c0 = arith.constant 0 : index
    %3 = memref.load %arg4[%c0] : memref<2xf32, #tpu.memory_space<smem>>
    %c0_1 = arith.constant 0 : index
    %c0_2 = arith.constant 0 : index
    %c0_3 = arith.constant 0 : index
    %c0_4 = arith.constant 0 : index
    %4 = vector.load %arg6[%c0_1, %c0_2, %c0_3, %c0_4] : memref<2x2x128x128xf32, #tpu.memory_space<vmem>>, vector<1x2x128x128xf32>
    %5 = vector.shape_cast %4 : vector<1x2x128x128xf32> to vector<2x128x128xf32>
    %6 = vector.broadcast %3 : f32 to vector<2x128x128xf32>
    %7 = arith.mulf %6, %5 : vector<2x128x128xf32>
    %c1 = arith.constant 1 : index
    %8 = memref.load %arg4[%c1] : memref<2xf32, #tpu.memory_space<smem>>
    %c1_5 = arith.constant 1 : index
    %c0_6 = arith.constant 0 : index
    %c0_7 = arith.constant 0 : index
    %c0_8 = arith.constant 0 : index
    %9 = vector.load %arg6[%c1_5, %c0_6, %c0_7, %c0_8] : memref<2x2x128x128xf32, #tpu.memory_space<vmem>>, vector<1x2x128x128xf32>
    %10 = vector.shape_cast %9 : vector<1x2x128x128xf32> to vector<2x128x128xf32>
    %11 = vector.broadcast %8 : f32 to vector<2x128x128xf32>
    %12 = arith.mulf %11, %10 : vector<2x128x128xf32>
    %13 = arith.addf %7, %12 : vector<2x128x128xf32>
    %14 = arith.truncf %13 : vector<2x128x128xf32> to vector<2x128x128xbf16>
    %c0_9 = arith.constant 0 : index
    %15 = memref.load %arg5[%c0_9] : memref<2xf32, #tpu.memory_space<smem>>
    %c0_10 = arith.constant 0 : index
    %c0_11 = arith.constant 0 : index
    %c0_12 = arith.constant 0 : index
    %c0_13 = arith.constant 0 : index
    %16 = vector.load %arg7[%c0_10, %c0_11, %c0_12, %c0_13] : memref<2x2x128x128xf32, #tpu.memory_space<vmem>>, vector<1x2x128x128xf32>
    %17 = vector.shape_cast %16 : vector<1x2x128x128xf32> to vector<2x128x128xf32>
    %18 = vector.broadcast %15 : f32 to vector<2x128x128xf32>
    %19 = arith.mulf %18, %17 : vector<2x128x128xf32>
    %c1_14 = arith.constant 1 : index
    %20 = memref.load %arg5[%c1_14] : memref<2xf32, #tpu.memory_space<smem>>
    %c1_15 = arith.constant 1 : index
    %c0_16 = arith.constant 0 : index
    %c0_17 = arith.constant 0 : index
    %c0_18 = arith.constant 0 : index
    %21 = vector.load %arg7[%c1_15, %c0_16, %c0_17, %c0_18] : memref<2x2x128x128xf32, #tpu.memory_space<vmem>>, vector<1x2x128x128xf32>
    %22 = vector.shape_cast %21 : vector<1x2x128x128xf32> to vector<2x128x128xf32>
    %23 = vector.broadcast %20 : f32 to vector<2x128x128xf32>
    %24 = arith.mulf %23, %22 : vector<2x128x128xf32>
    %25 = arith.addf %19, %24 : vector<2x128x128xf32>
    %26 = arith.truncf %25 : vector<2x128x128xf32> to vector<2x128x128xbf16>
    %c0_19 = arith.constant 0 : index
    %c0_20 = arith.constant 0 : index
    %c0_21 = arith.constant 0 : index
    %27 = vector.load %arg9[%c0_19, %c0_20, %c0_21] : memref<2x128x128xf32, #tpu.memory_space<vmem>>, vector<2x128x128xf32>
    "tpu.trace_start"() <{level = 10 : i32, message = "bik,bkj->bij"}> : () -> ()
    %cst = arith.constant dense<0.000000e+00> : vector<2x128x128xf32>
    %28 = tpu.matmul %14, %26, %cst {dimension_numbers = #tpu.dot_dimension_numbers<[2], [1], [1], [2], [0, 0, 0, 1, 1, 2], [0], [0]>} : vector<2x128x128xbf16>, vector<2x128x128xbf16>, vector<2x128x128xf32> -> vector<2x128x128xf32>
    "tpu.trace_stop"() : () -> ()
    %29 = arith.addf %27, %28 : vector<2x128x128xf32>
    %c0_22 = arith.constant 0 : index
    %c0_23 = arith.constant 0 : index
    %c0_24 = arith.constant 0 : index
    %30 = vector.load %arg9[%c0_22, %c0_23, %c0_24] : memref<2x128x128xf32, #tpu.memory_space<vmem>>, vector<2x128x128xf32>
    tpu.vector_store %arg9[%c0_22, %c0_23, %c0_24], %29 {strides = array<i32>} : memref<2x128x128xf32, #tpu.memory_space<vmem>>, vector<2x128x128xf32>,
    %c0_i32_25 = arith.constant 0 : i32
    %31 = arith.cmpi eq, %arg3, %c0_i32_25 : i32
    %32 = arith.extui %31 : i1 to i32
    %c0_i32_26 = arith.constant 0 : i32
    %33 = arith.cmpi ne, %32, %c0_i32_26 : i32
    scf.if %33 {
      %c0_27 = arith.constant 0 : index
      %c0_28 = arith.constant 0 : index
      %c0_29 = arith.constant 0 : index
      %34 = vector.load %arg9[%c0_27, %c0_28, %c0_29] : memref<2x128x128xf32, #tpu.memory_space<vmem>>, vector<2x128x128xf32>
      %c0_30 = arith.constant 0 : index
      %c0_31 = arith.constant 0 : index
      %c0_32 = arith.constant 0 : index
      %35 = vector.load %arg8[%c0_30, %c0_31, %c0_32] : memref<2x128x128xf32, #tpu.memory_space<vmem>>, vector<2x128x128xf32>
      tpu.vector_store %arg8[%c0_30, %c0_31, %c0_32], %34 {strides = array<i32>} : memref<2x128x128xf32, #tpu.memory_space<vmem>>, vector<2x128x128xf32>,
    } else {
    }
    return
  }
  func.func @transform_0(%arg0: i32, %arg1: i32, %arg2: i32, %arg3: i32) -> i32 {
    %c0_i32 = arith.constant 0 : i32
    %c0_i32_0 = arith.constant 0 : i32
    return %c0_i32 : i32
  }
  func.func @transform_1(%arg0: i32, %arg1: i32, %arg2: i32, %arg3: i32) -> i32 {
    %c0_i32 = arith.constant 0 : i32
    %c0_i32_0 = arith.constant 0 : i32
    return %c0_i32 : i32
  }
  func.func @transform_2(%arg0: i32, %arg1: i32, %arg2: i32, %arg3: i32) -> (i32, i32, i32, i32) {
    %c0_i32 = arith.constant 0 : i32
    %c0_i32_0 = arith.constant 0 : i32
    return %c0_i32, %arg0, %arg1, %arg3 : i32, i32, i32, i32
  }
  func.func @transform_3(%arg0: i32, %arg1: i32, %arg2: i32, %arg3: i32) -> (i32, i32, i32, i32) {
    %c0_i32 = arith.constant 0 : i32
    %c0_i32_0 = arith.constant 0 : i32
    return %c0_i32, %arg0, %arg3, %arg2 : i32, i32, i32, i32
  }
  func.func @transform_4(%arg0: i32, %arg1: i32, %arg2: i32, %arg3: i32) -> (i32, i32, i32) {
    %c0_i32 = arith.constant 0 : i32
    return %arg0, %arg1, %arg2 : i32, i32, i32
  }
}

</mosaic_0001>

<bundles_post_ra>
// kernel: tpu_custom_call.1
= control target key start
LH: loop header
LB: loop body
LE: loop exit
PB: predicated region body
PF: predicated region fallthrough
CT: control target
= control target key end

     0   :  { %9 = vsyncpa [#allocation6], 0  ;;  %s1309_s0 = inlined_call_operand.hbm [shape: f32[2], index: 0, kind: input, shape index: {}]   ;;  %s1310_s1 = inlined_call_operand.hbm [shape: f32[2], index: 1, kind: input, shape index: {}]   ;;  %s1311_s2 = inlined_call_operand.hbm [shape: f32[2,2,128,128], index: 2, kind: input, shape index: {}]   ;;  %s1312_s3 = inlined_call_operand.hbm [shape: f32[2,2,128,128], index: 3, kind: input, shape index: {}]   ;;  %s1313_s4 = inlined_call_operand.hbm [shape: f32[2,128,128], index: 4, kind: output, shape index: {}]  }
   0x1   :  { %10 = vsyncpa [#allocation8], 0 }
   0x2   :  { %11 = vsyncpa [#allocation4], 0 }
   0x3   :  { %12 = vsyncpa [#allocation11], 0 }
   0x4   :  { %13 = vsyncpa [#allocation5], 0  ;;  %s19_s17 = sshll.u32 %s1309_s0, 4  ;;  %s28_s20 = sshll.u32 %s1310_s1, 4  ;;  %s20_s17 = int_to_ptr.hbm [resolvable:$true] %s19_s17  ;;  %s29_s20 = int_to_ptr.hbm [resolvable:$true] %s28_s20 }
   0x5   :  { %s1111_s21 = smov [#allocation3]   ;;  %s1112_s22 = smov [#allocation7]  }
   0x6   :  { %22 = dma.hbm_to_smem %s20_s17, 16, %s1111_s21, [#allocation6]  }
   0x7   :  { %31 = dma.hbm_to_smem %s29_s20, 16, %s1112_s22, [#allocation8]  }
   0x8   :  { %s36_s25 = sshll.u32 %s1311_s2, 4  ;;  %s1113_s26 = smov [#allocation9]   ;;  %s37_s25 = int_to_ptr.hbm [resolvable:$true] %s36_s25 }
   0x9   :  { %s38_s27 = sshll.u32 %s1113_s26, 4  ;;  %s49_s29 = sshll.u32 %s1312_s3, 4  ;;  %s39_s27 = int_to_ptr.vmem [resolvable:$true] %s38_s27  ;;  %s50_s29 = int_to_ptr.hbm [resolvable:$true] %s49_s29 }
   0xa   :  { %s1114_s30 = smov 128   ;;  %s1115_s5 = smov 8  }
   0xb   :  { %44 = dma.hbm_to_vmem [thread:$0]  %s37_s25, 8192, %s39_s27, [#allocation4], %s1114_s30, %s1114_s30, %s1115_s5  }
   0xc   :  { %s1116_s1 = smov [#allocation10]  }
   0xd   :  { %s51_s6 = sshll.u32 %s1116_s1, 4  ;;  %s52_s6 = int_to_ptr.vmem [resolvable:$true] %s51_s6 }
   0xe   :  { %57 = dma.hbm_to_vmem [thread:$0]  %s50_s29, 8192, %s52_s6, [#allocation11], %s1114_s30, %s1114_s30, %s1115_s5  }
   0xf   :  { %1101 = dma.done.wait [#allocation6], 16  }
  0x10   :  { %1102 = vsyncadd [#allocation6], 4294967280 }
  0x11   :  { %1103 = dma.done.wait [#allocation8], 16  }
  0x12   :  { %1104 = vsyncadd [#allocation8], 4294967280 }
  0x13   :  { %1105 = dma.done.wait [#allocation4], 8192  }
  0x14   :  { %1106 = vsyncadd [#allocation4], 4294959104 }
  0x15   :  { %1107 = dma.done.wait [#allocation11], 8192  }
  0x16   :  { %1108 = vsyncadd [#allocation11], 4294959104 }
  0x17   :  { %74 = sfence }
  0x18   :  { %s308_s2 = sld [smem:[#allocation7]]  ;;  %v323_v0 = vld [vmem:[#allocation10 + $0x70] sm:$0xff]  ;;  %v324_v1 = vld [vmem:[#allocation10 + $0x78] sm:$0xff]  ;;  %v321_v9 = vld [vmem:[#allocation10 + $0x60] sm:$0xff]  ;;  %s1117_s9 = smov [#allocation12]  }
  0x19   :  { %s981_s3 = sld [smem:[#allocation7 + $0x1]]  ;;  %v390_v2 = vld [vmem:[#allocation10 + $0x170] sm:$0xff]  ;;  %v391_v3 = vld [vmem:[#allocation10 + $0x178] sm:$0xff]  ;;  %v322_v10 = vld [vmem:[#allocation10 + $0x68] sm:$0xff]  ;;  %s962_s10 = sshll.u32 %s1117_s9, 4  ;;  %s963_s10 = int_to_ptr.vmem [resolvable:$true] %s962_s10 }
  0x1a   :  { %v339_v4 = vld [vmem:[#allocation10 + $0xf0] sm:$0xff]  ;;  %v340_v5 = vld [vmem:[#allocation10 + $0xf8] sm:$0xff]  ;;  %v388_v11 = vld [vmem:[#allocation10 + $0x160] sm:$0xff]  ;;  %s1203_s7 = sld [smem:[#allocation3]]  ;;  %s964_s13 = sshll.u32 %s1313_s4, 4  ;;  %s965_s13 = int_to_ptr.hbm [resolvable:$true] %s964_s13 }
  0x1b   :  { %v406_v6 = vld [vmem:[#allocation10 + $0x1f0] sm:$0xff]  ;;  %v407_v7 = vld [vmem:[#allocation10 + $0x1f8] sm:$0xff]  ;;  %v389_v16 = vld [vmem:[#allocation10 + $0x168] sm:$0xff]  ;;  %s1216_s8 = sld [smem:[#allocation3 + $0x1]] }
  0x1c   :  { %v337_v21 = vld [vmem:[#allocation10 + $0xe0] sm:$0xff]  ;;  %v338_v22 = vld [vmem:[#allocation10 + $0xe8] sm:$0xff]  ;;  %v319_v45 = vld [vmem:[#allocation10 + $0x50] sm:$0xff] }
  0x1d   :  { %v404_v31 = vld [vmem:[#allocation10 + $0x1e0] sm:$0xff]  ;;  %v405_v32 = vld [vmem:[#allocation10 + $0x1e8] sm:$0xff]  ;;  %v320_v46 = vld [vmem:[#allocation10 + $0x58] sm:$0xff] }
  0x1e   :  { %v1161_v8 = vstv %s308_s2  ;;  %v386_v51 = vld [vmem:[#allocation10 + $0x150] sm:$0xff]  ;;  %v387_v56 = vld [vmem:[#allocation10 + $0x158] sm:$0xff] }
  0x1f   :  { %v356_v12 = vmul.f32 %v1161_v8, %v323_v0  ;;  %v357_v13 = vmul.f32 %v1161_v8, %v324_v1  ;;  %v1165_v14 = vstv %s981_s3  ;;  %v372_v15 = vmul.f32 %v1161_v8, %v339_v4  ;;  %v335_v57 = vld [vmem:[#allocation10 + $0xd0] sm:$0xff]  ;;  %v336_v62 = vld [vmem:[#allocation10 + $0xd8] sm:$0xff] }
  0x20   :  { %v423_v17 = vmul.f32 %v1165_v14, %v390_v2  ;;  %v424_v18 = vmul.f32 %v1165_v14, %v391_v3  ;;  %v373_v19 = vmul.f32 %v1161_v8, %v340_v5  ;;  %v439_v20 = vmul.f32 %v1165_v14, %v406_v6  ;;  %v402_v3 = vld [vmem:[#allocation10 + $0x1d0] sm:$0xff]  ;;  %v403_v4 = vld [vmem:[#allocation10 + $0x1d8] sm:$0xff]  ;;  %v317_v5 = vld [vmem:[#allocation10 + $0x40] sm:$0xff] }
  0x21   :  { %v440_v23 = vmul.f32 %v1165_v14, %v407_v7  ;;  %v354_v24 = vmul.f32 %v1161_v8, %v321_v9  ;;  %v355_v25 = vmul.f32 %v1161_v8, %v322_v10  ;;  %v421_v26 = vmul.f32 %v1165_v14, %v388_v11  ;;  %v318_v10 = vld [vmem:[#allocation10 + $0x48] sm:$0xff]  ;;  %v384_v11 = vld [vmem:[#allocation10 + $0x140] sm:$0xff] }
  0x22   :  { %v455_v27 = vadd.f32 %v423_v17, %v356_v12  ;;  %v456_v28 = vadd.f32 %v424_v18, %v357_v13  ;;  %v471_v29 = vadd.f32 %v439_v20, %v372_v15  ;;  %v422_v30 = vmul.f32 %v1165_v14, %v389_v16 }
  0x23   :  { %v472_v33 = vadd.f32 %v440_v23, %v373_v19  ;;  %v453_v34 = vadd.f32 %v421_v26, %v354_v24  ;;  %v370_v35 = vmul.f32 %v1161_v8, %v337_v21  ;;  %v371_v36 = vmul.f32 %v1161_v8, %v338_v22  ;;  %v385_v21 = vld [vmem:[#allocation10 + $0x148] sm:$0xff]  ;;  %v333_v22 = vld [vmem:[#allocation10 + $0xc0] sm:$0xff] }
  0x24   :  { %v487_v37 = vpack.c.bf16 %v455_v27, %v455_v27  ;;  %v488_v38 = vpack.c.bf16 %v456_v28, %v456_v28  ;;  %v503_v39 = vpack.c.bf16 %v471_v29, %v471_v29  ;;  %v454_v40 = vadd.f32 %v422_v30, %v355_v25  ;;  %v334_v27 = vld [vmem:[#allocation10 + $0xc8] sm:$0xff] }
  0x25   :  { %v504_v41 = vpack.c.bf16 %v472_v33, %v472_v33  ;;  %v485_v42 = vpack.c.bf16 %v453_v34, %v453_v34  ;;  %v437_v43 = vmul.f32 %v1165_v14, %v404_v31  ;;  %v438_v44 = vmul.f32 %v1165_v14, %v405_v32  ;;  %v400_v31 = vld [vmem:[#allocation10 + $0x1c0] sm:$0xff]  ;;  %v401_v32 = vld [vmem:[#allocation10 + $0x1c8] sm:$0xff] }
  0x26   :  { %v615_v47 = vunpack.c.l.b16 %v487_v37  ;;  %v616_v48 = vunpack.c.l.b16 %v488_v38  ;;  %v760_v49 = vunpack.c.l.b16 %v503_v39  ;;  %v486_v50 = vpack.c.bf16 %v454_v40, %v454_v40  ;;  %v315_v37 = vld [vmem:[#allocation10 + $0x30] sm:$0xff] }
  0x27   :  { %v761_v52 = vunpack.c.l.b16 %v504_v41  ;;  %v613_v53 = vunpack.c.l.b16 %v485_v42  ;;  %v469_v54 = vadd.f32 %v437_v43, %v370_v35  ;;  %v470_v55 = vadd.f32 %v438_v44, %v371_v36 }
  0x28   :  { %v624_v58 = vpack.c.b16 %v616_v48, %v615_v47  ;;  %v614_v59 = vunpack.c.l.b16 %v486_v50  ;;  %v352_v60 = vmul.f32 %v1161_v8, %v319_v45  ;;  %v353_v61 = vmul.f32 %v1161_v8, %v320_v46  ;;  %v316_v46 = vld [vmem:[#allocation10 + $0x38] sm:$0xff]  ;;  %v382_v47 = vld [vmem:[#allocation10 + $0x130] sm:$0xff] }
  0x29   :  { %v769_v63 = vpack.c.b16 %v761_v52, %v760_v49  ;;  %v501_v0 = vpack.c.bf16 %v469_v54, %v469_v54  ;;  %v502_v1 = vpack.c.bf16 %v470_v55, %v470_v55  ;;  %v419_v2 = vmul.f32 %v1165_v14, %v386_v51  ;;  %v383_v52 = vld [vmem:[#allocation10 + $0x138] sm:$0xff] }
  0x2a   :  { %633 = vmatpush.bf16.msra.mxu0 %v624_v58  ;;  %982 = vmatpush.bf16.msra.mxu2 %v624_v58  ;;  %v623_v6 = vpack.c.b16 %v614_v59, %v613_v53  ;;  %v420_v7 = vmul.f32 %v1165_v14, %v387_v56  ;;  %v368_v9 = vmul.f32 %v1161_v8, %v335_v57  ;;  %v331_v57 = vld [vmem:[#allocation10 + $0xb0] sm:$0xff]  ;;  %v332_v58 = vld [vmem:[#allocation10 + $0xb8] sm:$0xff] }
  0x2b   :  { %778 = vmatpush.bf16.msra.mxu1 %v769_v63  ;;  %990 = vmatpush.bf16.msra.mxu3 %v769_v63  ;;  %v758_v12 = vunpack.c.l.b16 %v501_v0  ;;  %v759_v13 = vunpack.c.l.b16 %v502_v1  ;;  %v451_v15 = vadd.f32 %v419_v2, %v352_v60  ;;  %v369_v16 = vmul.f32 %v1161_v8, %v336_v62  ;;  %v398_v2 = vld [vmem:[#allocation10 + $0x1b0] sm:$0xff] }
  0x2c   :  { %v452_v17 = vadd.f32 %v420_v7, %v353_v61  ;;  %v435_v18 = vmul.f32 %v1165_v14, %v402_v3  ;;  %v436_v19 = vmul.f32 %v1165_v14, %v403_v4  ;;  %v350_v20 = vmul.f32 %v1161_v8, %v317_v5  ;;  %v399_v3 = vld [vmem:[#allocation10 + $0x1b8] sm:$0xff]  ;;  %v313_v4 = vld [vmem:[#allocation10 + $0x20] sm:$0xff] }
  0x2d   :  { %v768_v23 = vpack.c.b16 %v759_v13, %v758_v12  ;;  %v483_v24 = vpack.c.bf16 %v451_v15, %v451_v15  ;;  %v351_v25 = vmul.f32 %v1161_v8, %v318_v10  ;;  %v417_v26 = vmul.f32 %v1165_v14, %v384_v11  ;;  %v380_v15 = vld [vmem:[#allocation10 + $0x120] sm:$0xff] }
  0x2e   :  { %634 = vmatpush.bf16.msra.mxu0 %v623_v6  ;;  %983 = vmatpush.bf16.msra.mxu2 %v623_v6  ;;  %v484_v28 = vpack.c.bf16 %v452_v17, %v452_v17  ;;  %v467_v29 = vadd.f32 %v435_v18, %v368_v9  ;;  %v468_v30 = vadd.f32 %v436_v19, %v369_v16  ;;  %v314_v9 = vld [vmem:[#allocation10 + $0x28] sm:$0xff] }
  0x2f   :  { %779 = vmatpush.bf16.msra.mxu1 %v768_v23  ;;  %991 = vmatpush.bf16.msra.mxu3 %v768_v23  ;;  %v611_v33 = vunpack.c.l.b16 %v483_v24  ;;  %v418_v34 = vmul.f32 %v1165_v14, %v385_v21  ;;  %v449_v35 = vadd.f32 %v417_v26, %v350_v20  ;;  %v366_v36 = vmul.f32 %v1161_v8, %v333_v22  ;;  %v381_v20 = vld [vmem:[#allocation10 + $0x128] sm:$0xff]  ;;  %v329_v21 = vld [vmem:[#allocation10 + $0xa0] sm:$0xff] }
  0x30   :  { %v612_v38 = vunpack.c.l.b16 %v484_v28  ;;  %v499_v39 = vpack.c.bf16 %v467_v29, %v467_v29  ;;  %v500_v40 = vpack.c.bf16 %v468_v30, %v468_v30  ;;  %v367_v41 = vmul.f32 %v1161_v8, %v334_v27  ;;  %v330_v22 = vld [vmem:[#allocation10 + $0xa8] sm:$0xff]  ;;  %v396_v26 = vld [vmem:[#allocation10 + $0x1a0] sm:$0xff] }
  0x31   :  { %v450_v42 = vadd.f32 %v418_v34, %v351_v25  ;;  %v481_v43 = vpack.c.bf16 %v449_v35, %v449_v35  ;;  %v433_v44 = vmul.f32 %v1165_v14, %v400_v31  ;;  %v434_v45 = vmul.f32 %v1165_v14, %v401_v32  ;;  %v397_v31 = vld [vmem:[#allocation10 + $0x1a8] sm:$0xff]  ;;  %v311_v32 = vld [vmem:[#allocation10 + $0x10] sm:$0xff] }
  0x32   :  { %v622_v48 = vpack.c.b16 %v612_v38, %v611_v33  ;;  %v756_v49 = vunpack.c.l.b16 %v499_v39  ;;  %v757_v50 = vunpack.c.l.b16 %v500_v40  ;;  %v348_v51 = vmul.f32 %v1161_v8, %v315_v37 }
  0x33   :  { %v482_v53 = vpack.c.bf16 %v450_v42, %v450_v42  ;;  %v609_v54 = vunpack.c.l.b16 %v481_v43  ;;  %v465_v55 = vadd.f32 %v433_v44, %v366_v36  ;;  %v466_v56 = vadd.f32 %v434_v45, %v367_v41  ;;  %v312_v41 = vld [vmem:[#allocation10 + $0x18] sm:$0xff] }
  0x34   :  { %635 = vmatpush.bf16.msra.mxu0 %v622_v48  ;;  %984 = vmatpush.bf16.msra.mxu2 %v622_v48  ;;  %v767_v59 = vpack.c.b16 %v757_v50, %v756_v49  ;;  %v349_v60 = vmul.f32 %v1161_v8, %v316_v46  ;;  %v415_v61 = vmul.f32 %v1165_v14, %v382_v47  ;;  %v378_v46 = vld [vmem:[#allocation10 + $0x110] sm:$0xff] }
  0x35   :  { %v610_v62 = vunpack.c.l.b16 %v482_v53  ;;  %v497_v63 = vpack.c.bf16 %v465_v55, %v465_v55  ;;  %v498_v0 = vpack.c.bf16 %v466_v56, %v466_v56  ;;  %v416_v1 = vmul.f32 %v1165_v14, %v383_v52  ;;  %v327_v52 = vld [vmem:[#allocation10 + $0x90] sm:$0xff]  ;;  %v328_v56 = vld [vmem:[#allocation10 + $0x98] sm:$0xff] }
  0x36   :  { %780 = vmatpush.bf16.msra.mxu1 %v767_v59  ;;  %992 = vmatpush.bf16.msra.mxu3 %v767_v59  ;;  %v447_v5 = vadd.f32 %v415_v61, %v348_v51  ;;  %v364_v6 = vmul.f32 %v1161_v8, %v331_v57  ;;  %v365_v7 = vmul.f32 %v1161_v8, %v332_v58  ;;  %v379_v51 = vld [vmem:[#allocation10 + $0x118] sm:$0xff]  ;;  %v394_v57 = vld [vmem:[#allocation10 + $0x190] sm:$0xff]  ;;  %v1220_v58 = vstv %s1203_s7 }
  0x37   :  { %v621_v10 = vpack.c.b16 %v610_v62, %v609_v54  ;;  %v754_v11 = vunpack.c.l.b16 %v497_v63  ;;  %v755_v12 = vunpack.c.l.b16 %v498_v0  ;;  %v448_v13 = vadd.f32 %v416_v1, %v349_v60  ;;  %v395_v63 = vld [vmem:[#allocation10 + $0x198] sm:$0xff] }
  0x38   :  { %v479_v16 = vpack.c.bf16 %v447_v5, %v447_v5  ;;  %v431_v17 = vmul.f32 %v1165_v14, %v398_v2  ;;  %v432_v18 = vmul.f32 %v1165_v14, %v399_v3  ;;  %v346_v19 = vmul.f32 %v1161_v8, %v313_v4  ;;  %v309_v4 = vld [vmem:[#allocation10] sm:$0xff]  ;;  %v310_v5 = vld [vmem:[#allocation10 + $0x8] sm:$0xff] }
  0x39   :  { %636 = vmatpush.bf16.msra.mxu0 %v621_v10  ;;  %985 = vmatpush.bf16.msra.mxu2 %v621_v10  ;;  %v766_v23 = vpack.c.b16 %v755_v12, %v754_v11  ;;  %v480_v24 = vpack.c.bf16 %v448_v13, %v448_v13  ;;  %v347_v25 = vmul.f32 %v1161_v8, %v314_v9 }
  0x3a   :  { %v607_v27 = vunpack.c.l.b16 %v479_v16  ;;  %v463_v28 = vadd.f32 %v431_v17, %v364_v6  ;;  %v464_v29 = vadd.f32 %v432_v18, %v365_v7  ;;  %v413_v30 = vmul.f32 %v1165_v14, %v380_v15  ;;  %v376_v16 = vld [vmem:[#allocation10 + $0x100] sm:$0xff]  ;;  %v377_v17 = vld [vmem:[#allocation10 + $0x108] sm:$0xff] }
  0x3b   :  { %781 = vmatpush.bf16.msra.mxu1 %v766_v23  ;;  %993 = vmatpush.bf16.msra.mxu3 %v766_v23  ;;  %v608_v33 = vunpack.c.l.b16 %v480_v24  ;;  %v414_v34 = vmul.f32 %v1165_v14, %v381_v20  ;;  %v362_v35 = vmul.f32 %v1161_v8, %v329_v21  ;;  %v363_v36 = vmul.f32 %v1161_v8, %v330_v22  ;;  %v325_v22 = vld [vmem:[#allocation10 + $0x80] sm:$0xff]  ;;  %v326_v23 = vld [vmem:[#allocation10 + $0x88] sm:$0xff] }
  0x3c   :  { %v495_v37 = vpack.c.bf16 %v463_v28, %v463_v28  ;;  %v496_v38 = vpack.c.bf16 %v464_v29, %v464_v29  ;;  %v445_v39 = vadd.f32 %v413_v30, %v346_v19  ;;  %v429_v40 = vmul.f32 %v1165_v14, %v396_v26 }
  0x3d   :  { %v620_v42 = vpack.c.b16 %v608_v33, %v607_v27  ;;  %v446_v43 = vadd.f32 %v414_v34, %v347_v25  ;;  %v430_v44 = vmul.f32 %v1165_v14, %v397_v31  ;;  %v344_v45 = vmul.f32 %v1161_v8, %v311_v32  ;;  %v392_v27 = vld [vmem:[#allocation10 + $0x180] sm:$0xff]  ;;  %v393_v33 = vld [vmem:[#allocation10 + $0x188] sm:$0xff] }
  0x3e   :  { %v752_v47 = vunpack.c.l.b16 %v495_v37  ;;  %v753_v48 = vunpack.c.l.b16 %v496_v38  ;;  %v477_v49 = vpack.c.bf16 %v445_v39, %v445_v39  ;;  %v461_v50 = vadd.f32 %v429_v40, %v362_v35  ;;  %v112_v34 = vld [vmem:[#allocation9] sm:$0xff]  ;;  %v113_v39 = vld [vmem:[#allocation9 + $0x8] sm:$0xff] }
  0x3f   :  { %637 = vmatpush.bf16.msra.mxu0 %v620_v42  ;;  %986 = vmatpush.bf16.msra.mxu2 %v620_v42  ;;  %v478_v53 = vpack.c.bf16 %v446_v43, %v446_v43  ;;  %v462_v54 = vadd.f32 %v430_v44, %v363_v36  ;;  %v345_v55 = vmul.f32 %v1161_v8, %v312_v41  ;;  %v1231_v28 = vstv %s1216_s8  ;;  %v179_v44 = vld [vmem:[#allocation9 + $0x100] sm:$0xff] }
  0x40   :  { %v765_v59 = vpack.c.b16 %v753_v48, %v752_v47  ;;  %v605_v60 = vunpack.c.l.b16 %v477_v49  ;;  %v493_v61 = vpack.c.bf16 %v461_v50, %v461_v50  ;;  %v411_v62 = vmul.f32 %v1165_v14, %v378_v46  ;;  %v180_v49 = vld [vmem:[#allocation9 + $0x108] sm:$0xff] }
  0x41   :  { %v606_v0 = vunpack.c.l.b16 %v478_v53  ;;  %v494_v1 = vpack.c.bf16 %v462_v54, %v462_v54  ;;  %v412_v2 = vmul.f32 %v1165_v14, %v379_v51  ;;  %v360_v3 = vmul.f32 %v1161_v8, %v327_v52 }
  0x42   :  { %782 = vmatpush.bf16.msra.mxu1 %v765_v59  ;;  %994 = vmatpush.bf16.msra.mxu3 %v765_v59  ;;  %v750_v6 = vunpack.c.l.b16 %v493_v61  ;;  %v443_v7 = vadd.f32 %v411_v62, %v344_v45  ;;  %v361_v9 = vmul.f32 %v1161_v8, %v328_v56  ;;  %v427_v10 = vmul.f32 %v1165_v14, %v394_v57  ;;  %v121_v57 = vld [vmem:[#allocation9 + $0x48] sm:$0xff]  ;;  %v187_v62 = vld [vmem:[#allocation9 + $0x140] sm:$0xff] }
  0x43   :  { %v619_v11 = vpack.c.b16 %v606_v0, %v605_v60  ;;  %v751_v12 = vunpack.c.l.b16 %v494_v1  ;;  %v444_v13 = vadd.f32 %v412_v2, %v345_v55  ;;  %v428_v15 = vmul.f32 %v1165_v14, %v395_v63  ;;  %v188_v63 = vld [vmem:[#allocation9 + $0x148] sm:$0xff] }
  0x44   :  { %v475_v18 = vpack.c.bf16 %v443_v7, %v443_v7  ;;  %v459_v19 = vadd.f32 %v427_v10, %v360_v3  ;;  %v342_v20 = vmul.f32 %v1161_v8, %v309_v4  ;;  %v343_v21 = vmul.f32 %v1161_v8, %v310_v5  ;;  %v128_v3 = vld [vmem:[#allocation9 + $0x80] sm:$0xff]  ;;  %v129_v4 = vld [vmem:[#allocation9 + $0x88] sm:$0xff] }
  0x45   :  { %638 = vmatpush.bf16.msra.mxu0 %v619_v11  ;;  %987 = vmatpush.bf16.msra.mxu2 %v619_v11  ;;  %v764_v24 = vpack.c.b16 %v751_v12, %v750_v6  ;;  %v476_v25 = vpack.c.bf16 %v444_v13, %v444_v13  ;;  %v460_v26 = vadd.f32 %v428_v15, %v361_v9  ;;  %v195_v15 = vld [vmem:[#allocation9 + $0x180] sm:$0xff] }
  0x46   :  { %v603_v29 = vunpack.c.l.b16 %v475_v18  ;;  %v491_v30 = vpack.c.bf16 %v459_v19, %v459_v19  ;;  %v409_v31 = vmul.f32 %v1165_v14, %v376_v16  ;;  %v410_v32 = vmul.f32 %v1165_v14, %v377_v17  ;;  %v196_v16 = vld [vmem:[#allocation9 + $0x188] sm:$0xff]  ;;  %v136_v17 = vld [vmem:[#allocation9 + $0xc0] sm:$0xff] }
  0x47   :  { %783 = vmatpush.bf16.msra.mxu1 %v764_v24  ;;  %995 = vmatpush.bf16.msra.mxu3 %v764_v24  ;;  %v604_v35 = vunpack.c.l.b16 %v476_v25  ;;  %v492_v36 = vpack.c.bf16 %v460_v26, %v460_v26  ;;  %v358_v37 = vmul.f32 %v1161_v8, %v325_v22  ;;  %v359_v38 = vmul.f32 %v1161_v8, %v326_v23  ;;  %v120_v8 = vld [vmem:[#allocation9 + $0x40] sm:$0xff] }
  0x48   :  { %v748_v40 = vunpack.c.l.b16 %v491_v30  ;;  %v441_v41 = vadd.f32 %v409_v31, %v342_v20  ;;  %v442_v42 = vadd.f32 %v410_v32, %v343_v21  ;;  %v425_v43 = vmul.f32 %v1165_v14, %v392_v27  ;;  %v137_v21 = vld [vmem:[#allocation9 + $0xc8] sm:$0xff]  ;;  %v203_v26 = vld [vmem:[#allocation9 + $0x1c0] sm:$0xff] }
  0x49   :  { %v618_v45 = vpack.c.b16 %v604_v35, %v603_v29  ;;  %v749_v46 = vunpack.c.l.b16 %v492_v36  ;;  %v426_v47 = vmul.f32 %v1165_v14, %v393_v33  ;;  %v145_v48 = vmul.f32 %v1220_v58, %v112_v34  ;;  %v204_v32 = vld [vmem:[#allocation9 + $0x1c8] sm:$0xff]  ;;  %v114_v33 = vld [vmem:[#allocation9 + $0x10] sm:$0xff] }
  0x4a   :  { %v473_v50 = vpack.c.bf16 %v441_v41, %v441_v41  ;;  %v474_v51 = vpack.c.bf16 %v442_v42, %v442_v42  ;;  %v457_v52 = vadd.f32 %v425_v43, %v358_v37  ;;  %v146_v53 = vmul.f32 %v1220_v58, %v113_v39  ;;  %v115_v37 = vld [vmem:[#allocation9 + $0x18] sm:$0xff]  ;;  %v181_v42 = vld [vmem:[#allocation9 + $0x110] sm:$0xff] }
  0x4b   :  { %639 = vmatpush.bf16.msra.mxu0 %v618_v45  ;;  %988 = vmatpush.bf16.msra.mxu2 %v618_v45  ;;  %v763_v54 = vpack.c.b16 %v749_v46, %v748_v40  ;;  %v458_v55 = vadd.f32 %v426_v47, %v359_v38  ;;  %v212_v56 = vmul.f32 %v1231_v28, %v179_v44  ;;  %v182_v43 = vld [vmem:[#allocation9 + $0x118] sm:$0xff] }
  0x4c   :  { %v601_v59 = vunpack.c.l.b16 %v473_v50  ;;  %v602_v60 = vunpack.c.l.b16 %v474_v51  ;;  %v489_v61 = vpack.c.bf16 %v457_v52, %v457_v52  ;;  %v213_v14 = vmul.f32 %v1231_v28, %v180_v49 }
  0x4d   :  { %784 = vmatpush.bf16.msra.mxu1 %v763_v54  ;;  %996 = vmatpush.bf16.msra.mxu3 %v763_v54  ;;  %v490_v0 = vpack.c.bf16 %v458_v55, %v458_v55  ;;  %v244_v1 = vadd.f32 %v212_v56, %v145_v48  ;;  %v153_v2 = vmul.f32 %v1220_v58, %v120_v8  ;;  %v122_v48 = vld [vmem:[#allocation9 + $0x50] sm:$0xff] }
  0x4e   :  { %v617_v5 = vpack.c.b16 %v602_v60, %v601_v59  ;;  %v746_v6 = vunpack.c.l.b16 %v489_v61  ;;  %v245_v7 = vadd.f32 %v213_v14, %v146_v53  ;;  %v154_v9 = vmul.f32 %v1220_v58, %v121_v57  ;;  %v123_v53 = vld [vmem:[#allocation9 + $0x58] sm:$0xff]  ;;  %v189_v57 = vld [vmem:[#allocation9 + $0x150] sm:$0xff] }
  0x4f   :  { %v747_v10 = vunpack.c.l.b16 %v490_v0  ;;  %v276_v11 = vpack.c.bf16 %v244_v1, %v244_v1  ;;  %v220_v12 = vmul.f32 %v1231_v28, %v187_v62  ;;  %v221_v13 = vmul.f32 %v1231_v28, %v188_v63  ;;  %v190_v59 = vld [vmem:[#allocation9 + $0x158] sm:$0xff]  ;;  %v130_v63 = vld [vmem:[#allocation9 + $0x90] sm:$0xff] }
  0x50   :  { %640 = vmatpush.bf16.msra.mxu0 %v617_v5  ;;  %989 = vmatpush.bf16.msra.mxu2 %v617_v5  ;;  %v277_v18 = vpack.c.bf16 %v245_v7, %v245_v7  ;;  %v161_v19 = vmul.f32 %v1220_v58, %v128_v3  ;;  %v162_v20 = vmul.f32 %v1220_v58, %v129_v4  ;;  %v131_v4 = vld [vmem:[#allocation9 + $0x98] sm:$0xff]  ;;  %v197_v5 = vld [vmem:[#allocation9 + $0x190] sm:$0xff] }
  0x51   :  { %v762_v22 = vpack.c.b16 %v747_v10, %v746_v6  ;;  %v553_v23 = vunpack.c.l.b16 %v276_v11  ;;  %v252_v24 = vadd.f32 %v220_v12, %v153_v2  ;;  %v253_v25 = vadd.f32 %v221_v13, %v154_v9  ;;  %v198_v11 = vld [vmem:[#allocation9 + $0x198] sm:$0xff] }
  0x52   :  { %v554_v27 = vunpack.c.l.b16 %v277_v18  ;;  %v228_v29 = vmul.f32 %v1231_v28, %v195_v15  ;;  %v229_v30 = vmul.f32 %v1231_v28, %v196_v16  ;;  %v169_v31 = vmul.f32 %v1220_v58, %v136_v17  ;;  %v138_v17 = vld [vmem:[#allocation9 + $0xd0] sm:$0xff] }
  0x53   :  { %785 = vmatpush.bf16.msra.mxu1 %v762_v22  ;;  %997 = vmatpush.bf16.msra.mxu3 %v762_v22  ;;  %v284_v34 = vpack.c.bf16 %v252_v24, %v252_v24  ;;  %v285_v35 = vpack.c.bf16 %v253_v25, %v253_v25  ;;  %v170_v36 = vmul.f32 %v1220_v58, %v137_v21  ;;  %v139_v22 = vld [vmem:[#allocation9 + $0xd8] sm:$0xff] }
  0x54   :  { %v569_v38 = vpack.c.b16 %v554_v27, %v553_v23  ;;  %v260_v39 = vadd.f32 %v228_v29, %v161_v19  ;;  %v261_v40 = vadd.f32 %v229_v30, %v162_v20  ;;  %v236_v41 = vmul.f32 %v1231_v28, %v203_v26  ;;  %v205_v23 = vld [vmem:[#allocation9 + $0x1d0] sm:$0xff]  ;;  %v206_v29 = vld [vmem:[#allocation9 + $0x1d8] sm:$0xff] }
  0x55   :  { %v561_v44 = vunpack.c.l.b16 %v284_v34  ;;  %v562_v45 = vunpack.c.l.b16 %v285_v35  ;;  %v237_v46 = vmul.f32 %v1231_v28, %v204_v32  ;;  %v147_v47 = vmul.f32 %v1220_v58, %v114_v33  ;;  %v116_v34 = vld [vmem:[#allocation9 + $0x20] sm:$0xff]  ;;  %v117_v35 = vld [vmem:[#allocation9 + $0x28] sm:$0xff] }
  0x56   :  { %641 = vmatmul.bf16.vlgmr.msra.gmra.mxu0 %v569_v38  ;;  %v292_v49 = vpack.c.bf16 %v260_v39, %v260_v39  ;;  %v293_v50 = vpack.c.bf16 %v261_v40, %v261_v40  ;;  %v268_v51 = vadd.f32 %v236_v41, %v169_v31  ;;  %v148_v52 = vmul.f32 %v1220_v58, %v115_v37  ;;  %v183_v39 = vld [vmem:[#allocation9 + $0x120] sm:$0xff] }
  0x57   :  { %v573_v8 = vpack.c.b16 %v562_v45, %v561_v44  ;;  %v269_v54 = vadd.f32 %v237_v46, %v170_v36  ;;  %v214_v55 = vmul.f32 %v1231_v28, %v181_v42  ;;  %v215_v56 = vmul.f32 %v1231_v28, %v182_v43  ;;  %v184_v44 = vld [vmem:[#allocation9 + $0x128] sm:$0xff] }
  0x58   :  { %v698_v60 = vunpack.c.l.b16 %v292_v49  ;;  %v699_v61 = vunpack.c.l.b16 %v293_v50  ;;  %v300_v14 = vpack.c.bf16 %v268_v51, %v268_v51  ;;  %v155_v62 = vmul.f32 %v1220_v58, %v122_v48  ;;  %v124_v49 = vld [vmem:[#allocation9 + $0x60] sm:$0xff]  ;;  %v125_v50 = vld [vmem:[#allocation9 + $0x68] sm:$0xff] }
  0x59   :  { %661 = vmatmul.bf16.vlgmr.msra.gmra.mxu2 %v573_v8  ;;  %v301_v0 = vpack.c.bf16 %v269_v54, %v269_v54  ;;  %v246_v1 = vadd.f32 %v214_v55, %v147_v47  ;;  %v247_v2 = vadd.f32 %v215_v56, %v148_v52  ;;  %v156_v3 = vmul.f32 %v1220_v58, %v123_v53  ;;  %v191_v51 = vld [vmem:[#allocation9 + $0x160] sm:$0xff]  ;;  %v192_v54 = vld [vmem:[#allocation9 + $0x168] sm:$0xff] }
  0x5a   :  { %v714_v6 = vpack.c.b16 %v699_v61, %v698_v60  ;;  %v706_v7 = vunpack.c.l.b16 %v300_v14  ;;  %v222_v9 = vmul.f32 %v1231_v28, %v189_v57  ;;  %v223_v10 = vmul.f32 %v1231_v28, %v190_v59 }
  0x5b   :  { %v707_v12 = vunpack.c.l.b16 %v301_v0  ;;  %v278_v13 = vpack.c.bf16 %v246_v1, %v246_v1  ;;  %v279_v15 = vpack.c.bf16 %v247_v2, %v247_v2  ;;  %v163_v16 = vmul.f32 %v1220_v58, %v130_v63  ;;  %v132_v63 = vld [vmem:[#allocation9 + $0xa0] sm:$0xff]  ;;  %v133_v0 = vld [vmem:[#allocation9 + $0xa8] sm:$0xff] }
  0x5c   :  { %786 = vmatmul.bf16.vlgmr.msra.gmra.mxu1 %v714_v6  ;;  %v254_v18 = vadd.f32 %v222_v9, %v155_v62  ;;  %v255_v19 = vadd.f32 %v223_v10, %v156_v3  ;;  %v164_v20 = vmul.f32 %v1220_v58, %v131_v4  ;;  %v230_v21 = vmul.f32 %v1231_v28, %v197_v5  ;;  %v199_v1 = vld [vmem:[#allocation9 + $0x1a0] sm:$0xff]  ;;  %v200_v6 = vld [vmem:[#allocation9 + $0x1a8] sm:$0xff] }
  0x5d   :  { %v718_v24 = vpack.c.b16 %v707_v12, %v706_v7  ;;  %v555_v25 = vunpack.c.l.b16 %v278_v13  ;;  %v556_v26 = vunpack.c.l.b16 %v279_v15  ;;  %v231_v27 = vmul.f32 %v1231_v28, %v198_v11  ;;  %v140_v13 = vld [vmem:[#allocation9 + $0xe0] sm:$0xff]  ;;  %v141_v15 = vld [vmem:[#allocation9 + $0xe8] sm:$0xff] }
  0x5e   :  { %v286_v30 = vpack.c.bf16 %v254_v18, %v254_v18  ;;  %v287_v31 = vpack.c.bf16 %v255_v19, %v255_v19  ;;  %v262_v32 = vadd.f32 %v230_v21, %v163_v16  ;;  %v171_v33 = vmul.f32 %v1220_v58, %v138_v17  ;;  %v207_v16 = vld [vmem:[#allocation9 + $0x1e0] sm:$0xff]  ;;  %v208_v21 = vld [vmem:[#allocation9 + $0x1e8] sm:$0xff] }
  0x5f   :  { %806 = vmatmul.bf16.vlgmr.msra.gmra.mxu3 %v718_v24  ;;  %v263_v36 = vadd.f32 %v231_v27, %v164_v20  ;;  %v172_v37 = vmul.f32 %v1220_v58, %v139_v22  ;;  %v238_v38 = vmul.f32 %v1231_v28, %v205_v23  ;;  %v239_v43 = vmul.f32 %v1231_v28, %v206_v29 }
  0x60   :  { %v563_v40 = vunpack.c.l.b16 %v286_v30  ;;  %v564_v41 = vunpack.c.l.b16 %v287_v31  ;;  %v294_v42 = vpack.c.bf16 %v262_v32, %v262_v32  ;;  %v149_v47 = vmul.f32 %v1220_v58, %v116_v34 }
  0x61   :  { %v295_v45 = vpack.c.bf16 %v263_v36, %v263_v36  ;;  %v270_v46 = vadd.f32 %v238_v38, %v171_v33  ;;  %v150_v48 = vmul.f32 %v1220_v58, %v117_v35  ;;  %v570_v52 = vpack.c.b16 %v556_v26, %v555_v25  ;;  %v118_v38 = vld [vmem:[#allocation9 + $0x30] sm:$0xff] }
  0x62   :  { %v271_v53 = vadd.f32 %v239_v43, %v172_v37  ;;  %v216_v8 = vmul.f32 %v1231_v28, %v183_v39  ;;  %v700_v55 = vunpack.c.l.b16 %v294_v42  ;;  %v217_v59 = vmul.f32 %v1231_v28, %v184_v44  ;;  %v119_v39 = vld [vmem:[#allocation9 + $0x38] sm:$0xff]  ;;  %v185_v42 = vld [vmem:[#allocation9 + $0x130] sm:$0xff] }
  0x63   :  { %v701_v56 = vunpack.c.l.b16 %v295_v45  ;;  %v302_v57 = vpack.c.bf16 %v270_v46, %v270_v46  ;;  %v157_v61 = vmul.f32 %v1220_v58, %v124_v49  ;;  %v158_v14 = vmul.f32 %v1220_v58, %v125_v50  ;;  %v186_v43 = vld [vmem:[#allocation9 + $0x138] sm:$0xff]  ;;  %v126_v49 = vld [vmem:[#allocation9 + $0x70] sm:$0xff] }
  0x64   :  { %v303_v60 = vpack.c.bf16 %v271_v53, %v271_v53  ;;  %v224_v62 = vmul.f32 %v1231_v28, %v191_v51  ;;  %v574_v2 = vpack.c.b16 %v564_v41, %v563_v40  ;;  %v248_v3 = vadd.f32 %v216_v8, %v149_v47  ;;  %v127_v8 = vld [vmem:[#allocation9 + $0x78] sm:$0xff] }
  0x65   :  { %v249_v4 = vadd.f32 %v217_v59, %v150_v48  ;;  %v225_v5 = vmul.f32 %v1231_v28, %v192_v54  ;;  %v708_v7 = vunpack.c.l.b16 %v302_v57  ;;  %v165_v10 = vmul.f32 %v1220_v58, %v132_v63  ;;  %v193_v54 = vld [vmem:[#allocation9 + $0x170] sm:$0xff] }
  0x66   :  { %646 = vmatmul.bf16.gmra.mxu0 %v570_v52  ;;  %v709_v9 = vunpack.c.l.b16 %v303_v60  ;;  %v166_v11 = vmul.f32 %v1220_v58, %v133_v0  ;;  %v232_v12 = vmul.f32 %v1231_v28, %v199_v1  ;;  %v715_v17 = vpack.c.b16 %v701_v56, %v700_v55  ;;  %v194_v55 = vld [vmem:[#allocation9 + $0x178] sm:$0xff]  ;;  %v134_v60 = vld [vmem:[#allocation9 + $0xb0] sm:$0xff] }
  0x67   :  { %v256_v18 = vadd.f32 %v224_v62, %v157_v61  ;;  %v257_v19 = vadd.f32 %v225_v5, %v158_v14  ;;  %v233_v20 = vmul.f32 %v1231_v28, %v200_v6  ;;  %v280_v22 = vpack.c.bf16 %v248_v3, %v248_v3  ;;  %v135_v0 = vld [vmem:[#allocation9 + $0xb8] sm:$0xff]  ;;  %v201_v1 = vld [vmem:[#allocation9 + $0x1b0] sm:$0xff] }
  0x68   :  { %v281_v23 = vpack.c.bf16 %v249_v4, %v249_v4  ;;  %v173_v24 = vmul.f32 %v1220_v58, %v140_v13  ;;  %v174_v25 = vmul.f32 %v1220_v58, %v141_v15  ;;  %v240_v26 = vmul.f32 %v1231_v28, %v207_v16  ;;  %v143_v15 = vld [vmem:[#allocation9 + $0xf8] sm:$0xff]  ;;  %v209_v16 = vld [vmem:[#allocation9 + $0x1f0] sm:$0xff] }
  0x69   :  { %666 = vmatmul.bf16.gmra.mxu2 %v574_v2  ;;  %v719_v27 = vpack.c.b16 %v709_v9, %v708_v7  ;;  %v264_v29 = vadd.f32 %v232_v12, %v165_v10  ;;  %v265_v30 = vadd.f32 %v233_v20, %v166_v11  ;;  %v241_v31 = vmul.f32 %v1231_v28, %v208_v21  ;;  %v202_v2 = vld [vmem:[#allocation9 + $0x1b8] sm:$0xff]  ;;  %v142_v9 = vld [vmem:[#allocation9 + $0xf0] sm:$0xff] }
  0x6a   :  { %v288_v32 = vpack.c.bf16 %v256_v18, %v256_v18  ;;  %v289_v33 = vpack.c.bf16 %v257_v19, %v257_v19  ;;  %v557_v34 = vunpack.c.l.b16 %v280_v22  ;;  %v558_v35 = vunpack.c.l.b16 %v281_v23 }
  0x6b   :  { %v272_v36 = vadd.f32 %v240_v26, %v173_v24  ;;  %v273_v37 = vadd.f32 %v241_v31, %v174_v25  ;;  %v296_v40 = vpack.c.bf16 %v264_v29, %v264_v29  ;;  %v297_v41 = vpack.c.bf16 %v265_v30, %v265_v30 }
  0x6c   :  { %791 = vmatmul.bf16.gmra.mxu1 %v715_v17  ;;  %v565_v44 = vunpack.c.l.b16 %v288_v32  ;;  %v566_v45 = vunpack.c.l.b16 %v289_v33  ;;  %v571_v46 = vpack.c.b16 %v558_v35, %v557_v34  ;;  %v151_v47 = vmul.f32 %v1220_v58, %v118_v38  ;;  %v210_v17 = vld [vmem:[#allocation9 + $0x1f8] sm:$0xff] }
  0x6d   :  { %v152_v48 = vmul.f32 %v1220_v58, %v119_v39  ;;  %v304_v50 = vpack.c.bf16 %v272_v36, %v272_v36  ;;  %v305_v51 = vpack.c.bf16 %v273_v37, %v273_v37  ;;  %v218_v52 = vmul.f32 %v1231_v28, %v185_v42 }
  0x6e   :  { %v219_v53 = vmul.f32 %v1231_v28, %v186_v43  ;;  %v702_v56 = vunpack.c.l.b16 %v296_v40  ;;  %v703_v57 = vunpack.c.l.b16 %v297_v41  ;;  %v575_v59 = vpack.c.b16 %v566_v45, %v565_v44 }
  0x6f   :  { %811 = vmatmul.bf16.gmra.mxu3 %v719_v27  ;;  %v159_v61 = vmul.f32 %v1220_v58, %v126_v49  ;;  %v160_v14 = vmul.f32 %v1220_v58, %v127_v8  ;;  %v226_v62 = vmul.f32 %v1231_v28, %v193_v54  ;;  %v227_v63 = vmul.f32 %v1231_v28, %v194_v55 }
  0x70   :  { %v710_v3 = vunpack.c.l.b16 %v304_v50  ;;  %v711_v4 = vunpack.c.l.b16 %v305_v51  ;;  %v250_v5 = vadd.f32 %v218_v52, %v151_v47  ;;  %v251_v6 = vadd.f32 %v219_v53, %v152_v48 }
  0x71   :  { %v716_v7 = vpack.c.b16 %v703_v57, %v702_v56  ;;  %v167_v10 = vmul.f32 %v1220_v58, %v134_v60  ;;  %v168_v11 = vmul.f32 %v1220_v58, %v135_v0  ;;  %v234_v12 = vmul.f32 %v1231_v28, %v201_v1 }
  0x72   :  { %v235_v13 = vmul.f32 %v1231_v28, %v202_v2  ;;  %v258_v18 = vadd.f32 %v226_v62, %v159_v61  ;;  %v259_v19 = vadd.f32 %v227_v63, %v160_v14  ;;  %v720_v20 = vpack.c.b16 %v711_v4, %v710_v3 }
  0x73   :  { %v282_v21 = vpack.c.bf16 %v250_v5, %v250_v5  ;;  %v283_v22 = vpack.c.bf16 %v251_v6, %v251_v6  ;;  %v175_v23 = vmul.f32 %v1220_v58, %v142_v9  ;;  %v176_v24 = vmul.f32 %v1220_v58, %v143_v15 }
  0x74   :  { %v242_v25 = vmul.f32 %v1231_v28, %v209_v16  ;;  %v243_v26 = vmul.f32 %v1231_v28, %v210_v17  ;;  %v266_v27 = vadd.f32 %v234_v12, %v167_v10  ;;  %v267_v29 = vadd.f32 %v235_v13, %v168_v11 }
  0x75   :  { %v290_v30 = vpack.c.bf16 %v258_v18, %v258_v18  ;;  %v291_v31 = vpack.c.bf16 %v259_v19, %v259_v19  ;;  %v559_v32 = vunpack.c.l.b16 %v282_v21  ;;  %v560_v33 = vunpack.c.l.b16 %v283_v22 }
  0x76   :  { %651 = vmatmul.bf16.gmra.mxu0 %v571_v46  ;;  %v274_v34 = vadd.f32 %v242_v25, %v175_v23  ;;  %v275_v35 = vadd.f32 %v243_v26, %v176_v24  ;;  %v298_v36 = vpack.c.bf16 %v266_v27, %v266_v27  ;;  %v299_v37 = vpack.c.bf16 %v267_v29, %v267_v29 }
  0x77   :  { %v567_v38 = vunpack.c.l.b16 %v290_v30  ;;  %v568_v39 = vunpack.c.l.b16 %v291_v31  ;;  %v572_v40 = vpack.c.b16 %v560_v33, %v559_v32 }
  0x78   :  { %v306_v58 = vpack.c.bf16 %v274_v34, %v274_v34  ;;  %v307_v41 = vpack.c.bf16 %v275_v35, %v275_v35  ;;  %v704_v42 = vunpack.c.l.b16 %v298_v36  ;;  %v705_v43 = vunpack.c.l.b16 %v299_v37 }
  0x79   :  { %671 = vmatmul.bf16.gmra.mxu2 %v575_v59  ;;  %v576_v28 = vpack.c.b16 %v568_v39, %v567_v38 }
  0x7a   :  { %v712_v44 = vunpack.c.l.b16 %v306_v58  ;;  %v713_v45 = vunpack.c.l.b16 %v307_v41  ;;  %v717_v46 = vpack.c.b16 %v705_v43, %v704_v42 }
  0x7c   :  { %796 = vmatmul.bf16.gmra.mxu1 %v716_v7  ;;  %v721_v47 = vpack.c.b16 %v713_v45, %v712_v44 }
  0x7f   :  { %816 = vmatmul.bf16.gmra.mxu3 %v720_v20 }
  0x86   :  { %656 = vmatmul.bf16.gmra.mxu0 %v572_v40 }
  0x89   :  { %676 = vmatmul.bf16.gmra.mxu2 %v576_v28 }
  0x8c   :  { %801 = vmatmul.bf16.gmra.mxu1 %v717_v46 }
  0x8f   :  { %821 = vmatmul.bf16.gmra.mxu3 %v721_v47 }
  0xd3   :  { %v642_v48 = vpop.f32.mrf.mxu0 }
  0xd4   :  { %926 = vst [vmem:[#allocation12] sm:$0xff] %v642_v48 }
  0xd9   :  { %v787_v49 = vpop.f32.mrf.mxu1 }
  0xda   :  { %942 = vst [vmem:[#allocation12 + $0x80] sm:$0xff] %v787_v49 }
  0xdb   :  { %v644_v50 = vpop.f32.mrf.mxu0 }
  0xdc   :  { %v662_v51 = vpop.f32.mrf.mxu2  ;;  %927 = vst [vmem:[#allocation12 + $0x8] sm:$0xff] %v644_v50 }
  0xdd   :  { %934 = vst [vmem:[#allocation12 + $0x40] sm:$0xff] %v662_v51 }
  0xe1   :  { %v789_v52 = vpop.f32.mrf.mxu1 }
  0xe2   :  { %v807_v53 = vpop.f32.mrf.mxu3  ;;  %943 = vst [vmem:[#allocation12 + $0x88] sm:$0xff] %v789_v52 }
  0xe3   :  { %950 = vst [vmem:[#allocation12 + $0xc0] sm:$0xff] %v807_v53  ;;  %v647_v8 = vpop.f32.mrf.mxu0 }
  0xe4   :  { %v664_v54 = vpop.f32.mrf.mxu2  ;;  %928 = vst [vmem:[#allocation12 + $0x10] sm:$0xff] %v647_v8 }
  0xe5   :  { %935 = vst [vmem:[#allocation12 + $0x48] sm:$0xff] %v664_v54 }
  0xe9   :  { %v792_v55 = vpop.f32.mrf.mxu1 }
  0xea   :  { %v809_v56 = vpop.f32.mrf.mxu3  ;;  %944 = vst [vmem:[#allocation12 + $0x90] sm:$0xff] %v792_v55 }
  0xeb   :  { %951 = vst [vmem:[#allocation12 + $0xc8] sm:$0xff] %v809_v56  ;;  %v649_v57 = vpop.f32.mrf.mxu0 }
  0xec   :  { %v667_v59 = vpop.f32.mrf.mxu2  ;;  %929 = vst [vmem:[#allocation12 + $0x18] sm:$0xff] %v649_v57 }
  0xed   :  { %936 = vst [vmem:[#allocation12 + $0x50] sm:$0xff] %v667_v59 }
  0xf1   :  { %v794_v60 = vpop.f32.mrf.mxu1 }
  0xf2   :  { %v812_v61 = vpop.f32.mrf.mxu3  ;;  %945 = vst [vmem:[#allocation12 + $0x98] sm:$0xff] %v794_v60 }
  0xf3   :  { %952 = vst [vmem:[#allocation12 + $0xd0] sm:$0xff] %v812_v61  ;;  %v652_v14 = vpop.f32.mrf.mxu0 }
  0xf4   :  { %v669_v62 = vpop.f32.mrf.mxu2  ;;  %930 = vst [vmem:[#allocation12 + $0x20] sm:$0xff] %v652_v14 }
  0xf5   :  { %937 = vst [vmem:[#allocation12 + $0x58] sm:$0xff] %v669_v62 }
  0xf9   :  { %v797_v63 = vpop.f32.mrf.mxu1 }
  0xfa   :  { %v814_v0 = vpop.f32.mrf.mxu3  ;;  %946 = vst [vmem:[#allocation12 + $0xa0] sm:$0xff] %v797_v63 }
  0xfb   :  { %953 = vst [vmem:[#allocation12 + $0xd8] sm:$0xff] %v814_v0  ;;  %v654_v1 = vpop.f32.mrf.mxu0 }
  0xfc   :  { %v672_v2 = vpop.f32.mrf.mxu2  ;;  %931 = vst [vmem:[#allocation12 + $0x28] sm:$0xff] %v654_v1 }
  0xfd   :  { %938 = vst [vmem:[#allocation12 + $0x60] sm:$0xff] %v672_v2 }
 0x101   :  { %v799_v3 = vpop.f32.mrf.mxu1 }
 0x102   :  { %v817_v4 = vpop.f32.mrf.mxu3  ;;  %947 = vst [vmem:[#allocation12 + $0xa8] sm:$0xff] %v799_v3 }
 0x103   :  { %954 = vst [vmem:[#allocation12 + $0xe0] sm:$0xff] %v817_v4  ;;  %v657_v5 = vpop.f32.mrf.mxu0 }
 0x104   :  { %v674_v6 = vpop.f32.mrf.mxu2  ;;  %932 = vst [vmem:[#allocation12 + $0x30] sm:$0xff] %v657_v5 }
 0x105   :  { %939 = vst [vmem:[#allocation12 + $0x68] sm:$0xff] %v674_v6 }
 0x109   :  { %v802_v7 = vpop.f32.mrf.mxu1 }
 0x10a   :  { %v819_v9 = vpop.f32.mrf.mxu3  ;;  %948 = vst [vmem:[#allocation12 + $0xb0] sm:$0xff] %v802_v7 }
 0x10b   :  { %955 = vst [vmem:[#allocation12 + $0xe8] sm:$0xff] %v819_v9  ;;  %v659_v10 = vpop.f32.mrf.mxu0 }
 0x10c   :  { %v677_v11 = vpop.f32.mrf.mxu2  ;;  %933 = vst [vmem:[#allocation12 + $0x38] sm:$0xff] %v659_v10 }
 0x10d   :  { %940 = vst [vmem:[#allocation12 + $0x70] sm:$0xff] %v677_v11 }
 0x111   :  { %v804_v12 = vpop.f32.mrf.mxu1 }
 0x112   :  { %v822_v13 = vpop.f32.mrf.mxu3  ;;  %949 = vst [vmem:[#allocation12 + $0xb8] sm:$0xff] %v804_v12 }
 0x113   :  { %956 = vst [vmem:[#allocation12 + $0xf0] sm:$0xff] %v822_v13 }
 0x114   :  { %v679_v15 = vpop.f32.mrf.mxu2 }
 0x115   :  { %941 = vst [vmem:[#allocation12 + $0x78] sm:$0xff] %v679_v15 }
 0x11a   :  { %v824_v16 = vpop.f32.mrf.mxu3 }
 0x11b   :  { %957 = vst [vmem:[#allocation12 + $0xf8] sm:$0xff] %v824_v16 }
 0x11c   :  { %970 = dma.vmem_to_hbm [thread:$0]  %s963_s10, 4096, %s965_s13, [#allocation5], %s1114_s30, %s1114_s30, %s1115_s5  }
 0x11d   :  { %1109 = dma.done.wait [#allocation5], 4096  }
 0x11e   :  { %1110 = vsyncadd [#allocation5], 4294963200 }
 0x11f   :  { %975 = vsyncpa [#allocation4], 1 }
 0x120   :  { %976 = vsyncpa [#allocation11], 1 }
 0x121   :  { %977 = vsyncpa [#allocation5], 1 }
 0x122   :  { %978 = vsyncpa [#allocation6], 1 }
 0x123   :  { %979 = vsyncpa [#allocation8], 1 }

</bundles_post_ra>
